<compile_context>
chip_gen: v6e
topology: v6e:2x2x1
jax: 0.10.0
libtpu: 0.0.40
codegen_flags: <defaults>
</compile_context>

<pallas_src>
import math
import functools

import jax
import jax.numpy as jnp
from jax.experimental import pallas as pl
from jax.experimental.pallas import tpu as pltpu


def _default_vmem_limit():
    # 75% of physical VMEM (96 MiB on v5e/v6e, 48 MiB on v7x), capped at 100 MiB.
    try:
        info = pltpu.get_tpu_info()
        cap = getattr(info, "vmem_capacity_bytes", None)
        if cap:
            return min(int(cap * 3 // 4), 100 * 1024 * 1024)
    except Exception:
        pass
    return 48 * 1024 * 1024


VMEM_LIMIT_BYTES = _default_vmem_limit()


def _tile(dim, pref):
    """Pick a tile size <= pref that divides dim (falls back to full dim)."""
    if dim <= pref:
        return dim
    t = pref
    while t > 8 and dim % t != 0:
        t //= 2
    return t if dim % t == 0 else dim


# --------------------------- tiled matmul kernel ----------------------------

def matmul_kernel(x_ref, w_ref, o_ref, acc_ref):
    # x: (tm, tk) bf16, w: (tk, tn) bf16 -> o: (tm, tn); accumulate over axis 2.
    @pl.when(pl.program_id(2) == 0)
    def _():
        acc_ref[...] = jnp.zeros_like(acc_ref)

    acc_ref[...] += jnp.dot(x_ref[...], w_ref[...],
                            preferred_element_type=jnp.float32)

    @pl.when(pl.program_id(2) == pl.num_programs(2) - 1)
    def _():
        o_ref[...] = acc_ref[...].astype(o_ref.dtype)


def pallas_matmul(x, w, *, tm=512, tn=256, tk=512, out_dtype=jnp.bfloat16):
    M, K = x.shape
    K2, N = w.shape
    assert K == K2
    tm, tn, tk = _tile(M, tm), _tile(N, tn), _tile(K, tk)
    grid = (M // tm, N // tn, K // tk)
    return pl.pallas_call(
        matmul_kernel,
        out_shape=jax.ShapeDtypeStruct((M, N), out_dtype),
        grid_spec=pltpu.PrefetchScalarGridSpec(
            num_scalar_prefetch=0,
            grid=grid,
            in_specs=[
                pl.BlockSpec((tm, tk), lambda i, j, k: (i, k)),
                pl.BlockSpec((tk, tn), lambda i, j, k: (k, j)),
            ],
            out_specs=pl.BlockSpec((tm, tn), lambda i, j, k: (i, j)),
            scratch_shapes=[pltpu.VMEM((tm, tn), jnp.float32)],
        ),
        compiler_params=pltpu.CompilerParams(
            dimension_semantics=("parallel", "parallel", "arbitrary"),
            vmem_limit_bytes=VMEM_LIMIT_BYTES),
    )(x, w)


# ------------------------ attention kernel (all heads) ----------------------

def attention_kernel(n_heads, dk, dv, q_ref, k_ref, v_ref, m_ref,
                     ctx_ref, attn_ref):
    # q: (1, tq, H*dk) bf16 (scale already folded into W_Q)
    # k: (1, Sk, H*dk) bf16   v: (1, Sk, H*dv) bf16
    # m: (1, tq, Sk) int8 (nonzero == masked)
    # ctx: (1, tq, H*dv) bf16   attn: (1, H, tq, Sk) bf16
    q = q_ref[0]
    k = k_ref[0]
    v = v_ref[0]
    masked = m_ref[0] != 0                        # (tq, Sk)
    neg = jnp.float32(-1e9)

    ctx_parts = []
    for h in range(n_heads):                      # static loop over heads
        qh = q[:, h * dk:(h + 1) * dk]            # (tq, dk)
        kh = k[:, h * dk:(h + 1) * dk]            # (Sk, dk)
        vh = v[:, h * dv:(h + 1) * dv]            # (Sk, dv)

        # Q K^T without an in-kernel transpose (contract last axes), bf16 MXU.
        scores = jax.lax.dot_general(
            qh, kh, (((1,), (1,)), ((), ())),
            preferred_element_type=jnp.float32)   # (tq, Sk) f32
        scores = jnp.where(masked, neg, scores)

        # numerically-stable softmax; exact reciprocal (attn is a module output)
        scores = scores - jnp.max(scores, axis=-1, keepdims=True)
        e = jnp.exp(scores)
        inv = 1.0 / jnp.sum(e, axis=-1, keepdims=True)
        attn = e * inv

        # per-head, lane-dense store: no stacked (H, tq, Sk) f32 temporaries
        attn_ref[0, h, :, :] = attn.astype(attn_ref.dtype)

        ctx_parts.append(jnp.dot(attn.astype(v.dtype), vh,
                                 preferred_element_type=jnp.float32))

    # single lane-dense ctx store (small: tq x H*dv)
    ctx_ref[0] = jnp.concatenate(ctx_parts, axis=-1).astype(ctx_ref.dtype)


def pallas_attention(Q, K, V, mask_i8, n_heads, dk, dv, *, tq=128):
    # Q: (B, Sq, H*dk)  K: (B, Sk, H*dk)  V: (B, Sk, H*dv)  mask: (B, Sq, Sk)
    # v6e/v5e: tq up to 256 is fine; v7x + long Sk: drop tq (or see flash TODO).
    B, Sq, HDk = Q.shape
    Sk = K.shape[1]
    HDv = V.shape[2]
    tq = _tile(Sq, tq)
    grid = (B, Sq // tq)
    kern = functools.partial(attention_kernel, n_heads, dk, dv)
    ctx, attn = pl.pallas_call(
        kern,
        out_shape=(jax.ShapeDtypeStruct((B, Sq, HDv), jnp.bfloat16),
                   jax.ShapeDtypeStruct((B, n_heads, Sq, Sk), jnp.bfloat16)),
        grid_spec=pltpu.PrefetchScalarGridSpec(
            num_scalar_prefetch=0,
            grid=grid,
            in_specs=[
                pl.BlockSpec((1, tq, HDk), lambda b, qi: (b, qi, 0)),
                pl.BlockSpec((1, Sk, HDk), lambda b, qi: (b, 0, 0)),
                pl.BlockSpec((1, Sk, HDv), lambda b, qi: (b, 0, 0)),
                pl.BlockSpec((1, tq, Sk), lambda b, qi: (b, qi, 0)),
            ],
            out_specs=[
                pl.BlockSpec((1, tq, HDv), lambda b, qi: (b, qi, 0)),
                pl.BlockSpec((1, n_heads, tq, Sk), lambda b, qi: (b, 0, qi, 0)),
            ],
        ),
        compiler_params=pltpu.CompilerParams(
            dimension_semantics=("parallel", "parallel"),
            vmem_limit_bytes=VMEM_LIMIT_BYTES),
    )(Q, K, V, mask_i8)
    return ctx, attn


# -------------- fused fc matmul + residual add + LayerNorm kernel ------------

def fc_ln_kernel(eps, ctx_ref, w_ref, res_ref, o_ref, acc_ref):
    # ctx: (tm, tk) bf16  w: (tk, N) bf16  res: (tm, N) f32  o: (tm, N) f32
    k = pl.program_id(1)

    @pl.when(k == 0)
    def _():
        acc_ref[...] = jnp.zeros_like(acc_ref)

    acc_ref[...] += jnp.dot(ctx_ref[...], w_ref[...],
                            preferred_element_type=jnp.float32)

    @pl.when(k == pl.num_programs(1) - 1)
    def _():
        y = acc_ref[...] + res_ref[...]
        mean = jnp.mean(y, axis=-1, keepdims=True)
        cen = y - mean
        var = jnp.mean(cen * cen, axis=-1, keepdims=True)
        o_ref[...] = (cen * jax.lax.rsqrt(var + eps)).astype(o_ref.dtype)


def pallas_fc_residual_layernorm(ctx2d, w_fc, res2d, *, tm=256, tk=512, eps=1e-5):
    # LayerNorm needs the full feature dim (N) resident; on v7x (64 MiB VMEM)
    # with very large d_model drop tm to 128.
    M, K = ctx2d.shape
    K2, N = w_fc.shape
    assert K == K2 and res2d.shape == (M, N)
    tm, tk = _tile(M, tm), _tile(K, tk)
    grid = (M // tm, K // tk)
    return pl.pallas_call(
        functools.partial(fc_ln_kernel, eps),
        out_shape=jax.ShapeDtypeStruct((M, N), jnp.float32),
        grid_spec=pltpu.PrefetchScalarGridSpec(
            num_scalar_prefetch=0,
            grid=grid,
            in_specs=[
                pl.BlockSpec((tm, tk), lambda i, k: (i, k)),
                pl.BlockSpec((tk, N), lambda i, k: (k, 0)),
                pl.BlockSpec((tm, N), lambda i, k: (i, 0)),
            ],
            out_specs=pl.BlockSpec((tm, N), lambda i, k: (i, 0)),
            scratch_shapes=[pltpu.VMEM((tm, N), jnp.float32)],
        ),
        compiler_params=pltpu.CompilerParams(
            dimension_semantics=("parallel", "arbitrary"),
            vmem_limit_bytes=VMEM_LIMIT_BYTES),
    )(ctx2d, w_fc, res2d)


# ----------------------------- forward function ------------------------------

@functools.partial(jax.jit, static_argnums=(0, 1, 2))
def mha_forward(n_heads, dk, dv, W_Q, W_K, W_V, W_fc,
                input_Q, input_K, input_V, attn_mask):
    B, Sq, D = input_Q.shape
    Sk = input_K.shape[1]

    # bf16 MXU operands; 1/sqrt(dk) folded into W_Q (one-time elementwise op,
    # fused by XLA with the bf16 cast) -> no per-tile Q scale in the kernel.
    scale = jnp.float32(1.0 / math.sqrt(dk))
    wq = (W_Q * scale).astype(jnp.bfloat16)
    wk = W_K.astype(jnp.bfloat16)
    wv = W_V.astype(jnp.bfloat16)
    wfc = W_fc.astype(jnp.bfloat16)

    xq = input_Q.astype(jnp.bfloat16).reshape(B * Sq, D)
    xk = input_K.astype(jnp.bfloat16).reshape(B * Sk, D)
    xv = input_V.astype(jnp.bfloat16).reshape(B * Sk, D)

    # Projections: tiled Pallas matmuls, bf16 in / bf16 out, f32 accumulation.
    q2d = pallas_matmul(xq, wq)   # (B*Sq, H*dk) bf16
    k2d = pallas_matmul(xk, wk)   # (B*Sk, H*dk) bf16
    v2d = pallas_matmul(xv, wv)   # (B*Sk, H*dv) bf16

    # Keep head-contiguous (B, S, H*d) layout; no transposes.
    Qa = q2d.reshape(B, Sq, n_heads * dk)
    Ka = k2d.reshape(B, Sk, n_heads * dk)
    Va = v2d.reshape(B, Sk, n_heads * dv)

    mask_i8 = attn_mask.astype(jnp.int8)           # (B, Sq, Sk)
    ctx, attn = pallas_attention(Qa, Ka, Va, mask_i8, n_heads, dk, dv)

    # ctx already (B, Sq, H*dv) bf16 -> fused fc + residual + LayerNorm (f32 out)
    out2d = pallas_fc_residual_layernorm(
        ctx.reshape(B * Sq, n_heads * dv), wfc,
        input_Q.reshape(B * Sq, D).astype(jnp.float32))
    return out2d.reshape(B, Sq, D), attn


# --------------------------- Module-level wrapper ---------------------------

class MultiHeadAttentionPallas:
    def __init__(self, d_model, d_k, n_heads, d_v, key):
        self.d_model = d_model
        self.dk = d_k
        self.n_heads = n_heads
        self.dv = d_v
        k1, k2, k3, k4 = jax.random.split(key, 4)
        # Weights stored PRE-TRANSPOSED as (in_features, out_features): y = x @ W.
        s = 1.0 / math.sqrt(d_model)
        self.W_Q = jax.random.uniform(k1, (d_model, d_k * n_heads), jnp.float32, -s, s)
        self.W_K = jax.random.uniform(k2, (d_model, d_k * n_heads), jnp.float32, -s, s)
        self.W_V = jax.random.uniform(k3, (d_model, d_v * n_heads), jnp.float32, -s, s)
        sf = 1.0 / math.sqrt(n_heads * d_v)
        self.W_fc = jax.random.uniform(k4, (n_heads * d_v, d_model), jnp.float32, -sf, sf)

    def __call__(self, input_Q, input_K, input_V, attn_mask):
        return mha_forward(self.n_heads, self.dk, self.dv,
                           self.W_Q, self.W_K, self.W_V, self.W_fc,
                           input_Q, input_K, input_V, attn_mask)


# ------------------------------ JAX reference -------------------------------

def reference(mha, input_Q, input_K, input_V, attn_mask):
    B, Sq, D = input_Q.shape
    H, dk, dv = mha.n_heads, mha.dk, mha.dv
    Q = (input_Q @ mha.W_Q).reshape(B, Sq, H, dk).transpose(0, 2, 1, 3)
    K = (input_K @ mha.W_K).reshape(B, -1, H, dk).transpose(0, 2, 1, 3)
    V = (input_V @ mha.W_V).reshape(B, -1, H, dv).transpose(0, 2, 1, 3)
    scores = jnp.einsum("bhqd,bhkd->bhqk", Q, K) / math.sqrt(dk)
    scores = jnp.where(attn_mask[:, None, :, :], -1e9, scores)
    attn = jax.nn.softmax(scores, axis=-1)
    ctx = jnp.einsum("bhqk,bhkd->bhqd", attn, V)
    ctx = ctx.transpose(0, 2, 1, 3).reshape(B, Sq, H * dv)
    out = ctx @ mha.W_fc + input_Q
    mean = out.mean(-1, keepdims=True)
    var = ((out - mean) ** 2).mean(-1, keepdims=True)
    return (out - mean) * jax.lax.rsqrt(var + 1e-5), attn


# ----------------------------------- main ------------------------------------

if __name__ == "__main__":
    d_model, d_k, n_heads, d_v = 32, 8, 4, 8
    batch, seq = 2, 8

    key = jax.random.PRNGKey(0)
    kp, kq, kk, kv = jax.random.split(key, 4)

    mha = MultiHeadAttentionPallas(d_model, d_k, n_heads, d_v, kp)

    input_Q = jax.random.normal(kq, (batch, seq, d_model), jnp.float32)
    input_K = jax.random.normal(kk, (batch, seq, d_model), jnp.float32)
    input_V = jax.random.normal(kv, (batch, seq, d_model), jnp.float32)

    # Padding-style mask: last 2 key positions masked out (True == masked).
    key_pos = jnp.arange(seq)
    attn_mask = jnp.broadcast_to(key_pos[None, None, :] >= seq - 2,
                                 (batch, seq, seq))

    out, attn = mha(input_Q, input_K, input_V, attn_mask)
    out = jax.block_until_ready(out)
    attn = jax.block_until_ready(attn)

    ref_out, ref_attn = reference(mha, input_Q, input_K, input_V, attn_mask)
    # Tolerance reflects bf16 MXU operands and bf16 attn/ctx storage.
    assert jnp.allclose(out, ref_out, rtol=2e-2, atol=2e-2), "output mismatch"
    assert jnp.allclose(attn.astype(jnp.float32), ref_attn,
                        rtol=2e-2, atol=2e-2), "attn mismatch"

    print("KERNEL_OK")
</pallas_src>

<mosaic_0001>
module attributes {stable_mosaic.version = 11 : i64} {
  func.func @fc_ln_kernel(%arg0: i32, %arg1: i32, %arg2: memref<16x32xbf16, #tpu.memory_space<vmem>>, %arg3: memref<32x32xbf16, #tpu.memory_space<vmem>>, %arg4: memref<16x32xf32, #tpu.memory_space<vmem>>, %arg5: memref<16x32xf32, #tpu.memory_space<vmem>>, %arg6: memref<16x32xf32, #tpu.memory_space<vmem>>) attributes {dimension_semantics = [#tpu.dimension_semantics<parallel>, #tpu.dimension_semantics<arbitrary>], iteration_bounds = array<i64: 1, 1>, scalar_prefetch = 0 : i64, scratch_operands = 1 : i64, tpu.core_type = #tpu.core_type<tc>, window_params = [{transform_indices = @transform_0, window_bounds = array<i64: 16, 32>}, {transform_indices = @transform_1, window_bounds = array<i64: 32, 32>}, {transform_indices = @transform_2, window_bounds = array<i64: 16, 32>}, {transform_indices = @transform_3, window_bounds = array<i64: 16, 32>}]} {
    %c0_i32 = arith.constant 0 : i32
    %0 = arith.cmpi eq, %arg1, %c0_i32 : i32
    %1 = arith.extui %0 : i1 to i32
    %c0_i32_0 = arith.constant 0 : i32
    %2 = arith.cmpi ne, %1, %c0_i32_0 : i32
    scf.if %2 {
      %cst_10 = arith.constant 0.000000e+00 : f32
      %12 = vector.broadcast %cst_10 : f32 to vector<16x32xf32>
      %c0_11 = arith.constant 0 : index
      %c0_12 = arith.constant 0 : index
      %13 = vector.load %arg6[%c0_11, %c0_12] : memref<16x32xf32, #tpu.memory_space<vmem>>, vector<16x32xf32>
      tpu.vector_store %arg6[%c0_11, %c0_12], %12 {strides = array<i32>} : memref<16x32xf32, #tpu.memory_space<vmem>>, vector<16x32xf32>,
    } else {
    }
    %c0 = arith.constant 0 : index
    %c0_1 = arith.constant 0 : index
    %3 = vector.load %arg6[%c0, %c0_1] : memref<16x32xf32, #tpu.memory_space<vmem>>, vector<16x32xf32>
    %c0_2 = arith.constant 0 : index
    %c0_3 = arith.constant 0 : index
    %4 = vector.load %arg2[%c0_2, %c0_3] : memref<16x32xbf16, #tpu.memory_space<vmem>>, vector<16x32xbf16>
    %c0_4 = arith.constant 0 : index
    %c0_5 = arith.constant 0 : index
    %5 = vector.load %arg3[%c0_4, %c0_5] : memref<32x32xbf16, #tpu.memory_space<vmem>>, vector<32x32xbf16>
    %cst = arith.constant dense<0.000000e+00> : vector<16x32xf32>
    %6 = tpu.matmul %4, %5, %cst {dimension_numbers = #tpu.dot_dimension_numbers<[1], [0], [0], [1], [0, 0, 1, 1], [], []>} : vector<16x32xbf16>, vector<32x32xbf16>, vector<16x32xf32> -> vector<16x32xf32>
    %7 = arith.addf %3, %6 : vector<16x32xf32>
    %c0_6 = arith.constant 0 : index
    %c0_7 = arith.constant 0 : index
    %8 = vector.load %arg6[%c0_6, %c0_7] : memref<16x32xf32, #tpu.memory_space<vmem>>, vector<16x32xf32>
    tpu.vector_store %arg6[%c0_6, %c0_7], %7 {strides = array<i32>} : memref<16x32xf32, #tpu.memory_space<vmem>>, vector<16x32xf32>,
    %c0_i32_8 = arith.constant 0 : i32
    %9 = arith.cmpi eq, %arg1, %c0_i32_8 : i32
    %10 = arith.extui %9 : i1 to i32
    %c0_i32_9 = arith.constant 0 : i32
    %11 = arith.cmpi ne, %10, %c0_i32_9 : i32
    scf.if %11 {
      %c0_10 = arith.constant 0 : index
      %c0_11 = arith.constant 0 : index
      %12 = vector.load %arg6[%c0_10, %c0_11] : memref<16x32xf32, #tpu.memory_space<vmem>>, vector<16x32xf32>
      %c0_12 = arith.constant 0 : index
      %c0_13 = arith.constant 0 : index
      %13 = vector.load %arg4[%c0_12, %c0_13] : memref<16x32xf32, #tpu.memory_space<vmem>>, vector<16x32xf32>
      %14 = arith.addf %12, %13 : vector<16x32xf32>
      %cst_14 = arith.constant dense<0.000000e+00> : vector<16xf32>
      %15 = vector.multi_reduction <add>, %14, %cst_14 [1] : vector<16x32xf32> to vector<16xf32>
      %16 = vector.shape_cast %15 : vector<16xf32> to vector<16x1xf32>
      %cst_15 = arith.constant 3.200000e+01 : f32
      %17 = vector.broadcast %cst_15 : f32 to vector<16x1xf32>
      %18 = arith.divf %16, %17 : vector<16x1xf32>
      %19 = vector.broadcast %18 : vector<16x1xf32> to vector<16x32xf32>
      %20 = arith.subf %14, %19 : vector<16x32xf32>
      %21 = arith.mulf %20, %20 : vector<16x32xf32>
      %cst_16 = arith.constant dense<0.000000e+00> : vector<16xf32>
      %22 = vector.multi_reduction <add>, %21, %cst_16 [1] : vector<16x32xf32> to vector<16xf32>
      %23 = vector.shape_cast %22 : vector<16xf32> to vector<16x1xf32>
      %cst_17 = arith.constant 3.200000e+01 : f32
      %24 = vector.broadcast %cst_17 : f32 to vector<16x1xf32>
      %25 = arith.divf %23, %24 : vector<16x1xf32>
      %cst_18 = arith.constant 9.99999974E-6 : f32
      %26 = vector.broadcast %cst_18 : f32 to vector<16x1xf32>
      %27 = arith.addf %25, %26 : vector<16x1xf32>
      %28 = math.rsqrt %27 : vector<16x1xf32>
      %29 = vector.broadcast %28 : vector<16x1xf32> to vector<16x32xf32>
      %30 = arith.mulf %20, %29 : vector<16x32xf32>
      %c0_19 = arith.constant 0 : index
      %c0_20 = arith.constant 0 : index
      %31 = vector.load %arg5[%c0_19, %c0_20] : memref<16x32xf32, #tpu.memory_space<vmem>>, vector<16x32xf32>
      tpu.vector_store %arg5[%c0_19, %c0_20], %30 {strides = array<i32>} : memref<16x32xf32, #tpu.memory_space<vmem>>, vector<16x32xf32>,
    } else {
    }
    return
  }
  func.func @transform_0(%arg0: i32, %arg1: i32) -> (i32, i32) {
    %c0_i32 = arith.constant 0 : i32
    return %arg0, %arg1 : i32, i32
  }
  func.func @transform_1(%arg0: i32, %arg1: i32) -> (i32, i32) {
    %c0_i32 = arith.constant 0 : i32
    %c0_i32_0 = arith.constant 0 : i32
    return %arg1, %c0_i32 : i32, i32
  }
  func.func @transform_2(%arg0: i32, %arg1: i32) -> (i32, i32) {
    %c0_i32 = arith.constant 0 : i32
    %c0_i32_0 = arith.constant 0 : i32
    return %arg0, %c0_i32 : i32, i32
  }
  func.func @transform_3(%arg0: i32, %arg1: i32) -> (i32, i32) {
    %c0_i32 = arith.constant 0 : i32
    %c0_i32_0 = arith.constant 0 : i32
    return %arg0, %c0_i32 : i32, i32
  }
}

module attributes {stable_mosaic.version = 11 : i64} {
  func.func @matmul_kernel(%arg0: i32, %arg1: i32, %arg2: i32, %arg3: memref<16x32xbf16, #tpu.memory_space<vmem>>, %arg4: memref<32x32xbf16, #tpu.memory_space<vmem>>, %arg5: memref<16x32xbf16, #tpu.memory_space<vmem>>, %arg6: memref<16x32xf32, #tpu.memory_space<vmem>>) attributes {dimension_semantics = [#tpu.dimension_semantics<parallel>, #tpu.dimension_semantics<parallel>, #tpu.dimension_semantics<arbitrary>], iteration_bounds = array<i64: 1, 1, 1>, scalar_prefetch = 0 : i64, scratch_operands = 1 : i64, tpu.core_type = #tpu.core_type<tc>, window_params = [{transform_indices = @transform_0, window_bounds = array<i64: 16, 32>}, {transform_indices = @transform_1, window_bounds = array<i64: 32, 32>}, {transform_indices = @transform_2, window_bounds = array<i64: 16, 32>}]} {
    %c0_i32 = arith.constant 0 : i32
    %0 = arith.cmpi eq, %arg2, %c0_i32 : i32
    %1 = arith.extui %0 : i1 to i32
    %c0_i32_0 = arith.constant 0 : i32
    %2 = arith.cmpi ne, %1, %c0_i32_0 : i32
    scf.if %2 {
      %cst_10 = arith.constant 0.000000e+00 : f32
      %12 = vector.broadcast %cst_10 : f32 to vector<16x32xf32>
      %c0_11 = arith.constant 0 : index
      %c0_12 = arith.constant 0 : index
      %13 = vector.load %arg6[%c0_11, %c0_12] : memref<16x32xf32, #tpu.memory_space<vmem>>, vector<16x32xf32>
      tpu.vector_store %arg6[%c0_11, %c0_12], %12 {strides = array<i32>} : memref<16x32xf32, #tpu.memory_space<vmem>>, vector<16x32xf32>,
    } else {
    }
    %c0 = arith.constant 0 : index
    %c0_1 = arith.constant 0 : index
    %3 = vector.load %arg6[%c0, %c0_1] : memref<16x32xf32, #tpu.memory_space<vmem>>, vector<16x32xf32>
    %c0_2 = arith.constant 0 : index
    %c0_3 = arith.constant 0 : index
    %4 = vector.load %arg3[%c0_2, %c0_3] : memref<16x32xbf16, #tpu.memory_space<vmem>>, vector<16x32xbf16>
    %c0_4 = arith.constant 0 : index
    %c0_5 = arith.constant 0 : index
    %5 = vector.load %arg4[%c0_4, %c0_5] : memref<32x32xbf16, #tpu.memory_space<vmem>>, vector<32x32xbf16>
    %cst = arith.constant dense<0.000000e+00> : vector<16x32xf32>
    %6 = tpu.matmul %4, %5, %cst {dimension_numbers = #tpu.dot_dimension_numbers<[1], [0], [0], [1], [0, 0, 1, 1], [], []>} : vector<16x32xbf16>, vector<32x32xbf16>, vector<16x32xf32> -> vector<16x32xf32>
    %7 = arith.addf %3, %6 : vector<16x32xf32>
    %c0_6 = arith.constant 0 : index
    %c0_7 = arith.constant 0 : index
    %8 = vector.load %arg6[%c0_6, %c0_7] : memref<16x32xf32, #tpu.memory_space<vmem>>, vector<16x32xf32>
    tpu.vector_store %arg6[%c0_6, %c0_7], %7 {strides = array<i32>} : memref<16x32xf32, #tpu.memory_space<vmem>>, vector<16x32xf32>,
    %c0_i32_8 = arith.constant 0 : i32
    %9 = arith.cmpi eq, %arg2, %c0_i32_8 : i32
    %10 = arith.extui %9 : i1 to i32
    %c0_i32_9 = arith.constant 0 : i32
    %11 = arith.cmpi ne, %10, %c0_i32_9 : i32
    scf.if %11 {
      %c0_10 = arith.constant 0 : index
      %c0_11 = arith.constant 0 : index
      %12 = vector.load %arg6[%c0_10, %c0_11] : memref<16x32xf32, #tpu.memory_space<vmem>>, vector<16x32xf32>
      %13 = arith.truncf %12 : vector<16x32xf32> to vector<16x32xbf16>
      %c0_12 = arith.constant 0 : index
      %c0_13 = arith.constant 0 : index
      %14 = vector.load %arg5[%c0_12, %c0_13] : memref<16x32xbf16, #tpu.memory_space<vmem>>, vector<16x32xbf16>
      tpu.vector_store %arg5[%c0_12, %c0_13], %13 {strides = array<i32>} : memref<16x32xbf16, #tpu.memory_space<vmem>>, vector<16x32xbf16>,
    } else {
    }
    return
  }
  func.func @transform_0(%arg0: i32, %arg1: i32, %arg2: i32) -> (i32, i32) {
    %c0_i32 = arith.constant 0 : i32
    return %arg0, %arg2 : i32, i32
  }
  func.func @transform_1(%arg0: i32, %arg1: i32, %arg2: i32) -> (i32, i32) {
    %c0_i32 = arith.constant 0 : i32
    return %arg2, %arg1 : i32, i32
  }
  func.func @transform_2(%arg0: i32, %arg1: i32, %arg2: i32) -> (i32, i32) {
    %c0_i32 = arith.constant 0 : i32
    return %arg0, %arg1 : i32, i32
  }
}

module attributes {stable_mosaic.version = 11 : i64} {
  func.func @attention_kernel(%arg0: i32, %arg1: i32, %arg2: memref<1x8x32xbf16, #tpu.memory_space<vmem>>, %arg3: memref<1x8x32xbf16, #tpu.memory_space<vmem>>, %arg4: memref<1x8x32xbf16, #tpu.memory_space<vmem>>, %arg5: memref<1x8x8xi8, #tpu.memory_space<vmem>>, %arg6: memref<1x8x32xbf16, #tpu.memory_space<vmem>>, %arg7: memref<1x4x8x8xbf16, #tpu.memory_space<vmem>>) attributes {dimension_semantics = [#tpu.dimension_semantics<parallel>, #tpu.dimension_semantics<parallel>], iteration_bounds = array<i64: 2, 1>, scalar_prefetch = 0 : i64, scratch_operands = 0 : i64, tpu.core_type = #tpu.core_type<tc>, window_params = [{transform_indices = @transform_0, window_bounds = array<i64: 1, 8, 32>}, {transform_indices = @transform_1, window_bounds = array<i64: 1, 8, 32>}, {transform_indices = @transform_2, window_bounds = array<i64: 1, 8, 32>}, {transform_indices = @transform_3, window_bounds = array<i64: 1, 8, 8>}, {transform_indices = @transform_4, window_bounds = array<i64: 1, 8, 32>}, {transform_indices = @transform_5, window_bounds = array<i64: 1, 4, 8, 8>}]} {
    %c0 = arith.constant 0 : index
    %c0_0 = arith.constant 0 : index
    %c0_1 = arith.constant 0 : index
    %0 = vector.load %arg2[%c0, %c0_0, %c0_1] : memref<1x8x32xbf16, #tpu.memory_space<vmem>>, vector<1x8x32xbf16>
    %1 = vector.shape_cast %0 : vector<1x8x32xbf16> to vector<8x32xbf16>
    %c0_2 = arith.constant 0 : index
    %c0_3 = arith.constant 0 : index
    %c0_4 = arith.constant 0 : index
    %2 = vector.load %arg3[%c0_2, %c0_3, %c0_4] : memref<1x8x32xbf16, #tpu.memory_space<vmem>>, vector<1x8x32xbf16>
    %3 = vector.shape_cast %2 : vector<1x8x32xbf16> to vector<8x32xbf16>
    %c0_5 = arith.constant 0 : index
    %c0_6 = arith.constant 0 : index
    %c0_7 = arith.constant 0 : index
    %4 = vector.load %arg4[%c0_5, %c0_6, %c0_7] : memref<1x8x32xbf16, #tpu.memory_space<vmem>>, vector<1x8x32xbf16>
    %5 = vector.shape_cast %4 : vector<1x8x32xbf16> to vector<8x32xbf16>
    %c0_8 = arith.constant 0 : index
    %c0_9 = arith.constant 0 : index
    %c0_10 = arith.constant 0 : index
    %6 = vector.load %arg5[%c0_8, %c0_9, %c0_10] : memref<1x8x8xi8, #tpu.memory_space<vmem>>, vector<1x8x8xi8>
    %7 = vector.shape_cast %6 : vector<1x8x8xi8> to vector<8x8xi8>
    %c0_i8 = arith.constant 0 : i8
    %8 = vector.broadcast %c0_i8 : i8 to vector<8x8xi8>
    %9 = arith.cmpi ne, %7, %8 : vector<8x8xi8>
    %10 = vector.extract_strided_slice %1 {offsets = [0, 0], sizes = [8, 8], strides = [1, 1]} : vector<8x32xbf16> to vector<8x8xbf16>
    %11 = vector.extract_strided_slice %3 {offsets = [0, 0], sizes = [8, 8], strides = [1, 1]} : vector<8x32xbf16> to vector<8x8xbf16>
    %12 = vector.extract_strided_slice %5 {offsets = [0, 0], sizes = [8, 8], strides = [1, 1]} : vector<8x32xbf16> to vector<8x8xbf16>
    %cst = arith.constant dense<0.000000e+00> : vector<8x8xf32>
    %13 = tpu.matmul %10, %11, %cst {dimension_numbers = #tpu.dot_dimension_numbers<[1], [1], [0], [0], [0, 0, 1, 0], [], []>} : vector<8x8xbf16>, vector<8x8xbf16>, vector<8x8xf32> -> vector<8x8xf32>
    %cst_11 = arith.constant -1.000000e+09 : f32
    %14 = vector.broadcast %cst_11 : f32 to vector<8x8xf32>
    %15 = arith.select %9, %14, %13 : vector<8x8xi1>, vector<8x8xf32>
    %cst_12 = arith.constant dense<0xFF800000> : vector<8xf32>
    %16 = vector.multi_reduction <maximumf>, %15, %cst_12 [1] : vector<8x8xf32> to vector<8xf32>
    %17 = vector.shape_cast %16 : vector<8xf32> to vector<8x1xf32>
    %18 = vector.broadcast %17 : vector<8x1xf32> to vector<8x8xf32>
    %19 = arith.subf %15, %18 : vector<8x8xf32>
    %20 = math.exp %19 : vector<8x8xf32>
    %cst_13 = arith.constant dense<0.000000e+00> : vector<8xf32>
    %21 = vector.multi_reduction <add>, %20, %cst_13 [1] : vector<8x8xf32> to vector<8xf32>
    %22 = vector.shape_cast %21 : vector<8xf32> to vector<8x1xf32>
    %cst_14 = arith.constant 1.000000e+00 : f32
    %23 = vector.broadcast %cst_14 : f32 to vector<8x1xf32>
    %24 = arith.divf %23, %22 : vector<8x1xf32>
    %25 = vector.broadcast %24 : vector<8x1xf32> to vector<8x8xf32>
    %26 = arith.mulf %20, %25 : vector<8x8xf32>
    %27 = arith.truncf %26 : vector<8x8xf32> to vector<8x8xbf16>
    %c0_15 = arith.constant 0 : index
    %c0_16 = arith.constant 0 : index
    %c0_17 = arith.constant 0 : index
    %c0_18 = arith.constant 0 : index
    %28 = vector.load %arg7[%c0_15, %c0_16, %c0_17, %c0_18] : memref<1x4x8x8xbf16, #tpu.memory_space<vmem>>, vector<1x1x8x8xbf16>
    %29 = vector.shape_cast %28 : vector<1x1x8x8xbf16> to vector<8x8xbf16>
    %30 = vector.shape_cast %27 : vector<8x8xbf16> to vector<1x1x8x8xbf16>
    tpu.vector_store %arg7[%c0_15, %c0_16, %c0_17, %c0_18], %30 {strides = array<i32>} : memref<1x4x8x8xbf16, #tpu.memory_space<vmem>>, vector<1x1x8x8xbf16>,
    %31 = arith.truncf %26 : vector<8x8xf32> to vector<8x8xbf16>
    %cst_19 = arith.constant dense<0.000000e+00> : vector<8x8xf32>
    %32 = tpu.matmul %31, %12, %cst_19 {dimension_numbers = #tpu.dot_dimension_numbers<[1], [0], [0], [1], [0, 0, 1, 1], [], []>} : vector<8x8xbf16>, vector<8x8xbf16>, vector<8x8xf32> -> vector<8x8xf32>
    %33 = vector.extract_strided_slice %1 {offsets = [0, 8], sizes = [8, 8], strides = [1, 1]} : vector<8x32xbf16> to vector<8x8xbf16>
    %34 = vector.extract_strided_slice %3 {offsets = [0, 8], sizes = [8, 8], strides = [1, 1]} : vector<8x32xbf16> to vector<8x8xbf16>
    %35 = vector.extract_strided_slice %5 {offsets = [0, 8], sizes = [8, 8], strides = [1, 1]} : vector<8x32xbf16> to vector<8x8xbf16>
    %cst_20 = arith.constant dense<0.000000e+00> : vector<8x8xf32>
    %36 = tpu.matmul %33, %34, %cst_20 {dimension_numbers = #tpu.dot_dimension_numbers<[1], [1], [0], [0], [0, 0, 1, 0], [], []>} : vector<8x8xbf16>, vector<8x8xbf16>, vector<8x8xf32> -> vector<8x8xf32>
    %cst_21 = arith.constant -1.000000e+09 : f32
    %37 = vector.broadcast %cst_21 : f32 to vector<8x8xf32>
    %38 = arith.select %9, %37, %36 : vector<8x8xi1>, vector<8x8xf32>
    %cst_22 = arith.constant dense<0xFF800000> : vector<8xf32>
    %39 = vector.multi_reduction <maximumf>, %38, %cst_22 [1] : vector<8x8xf32> to vector<8xf32>
    %40 = vector.shape_cast %39 : vector<8xf32> to vector<8x1xf32>
    %41 = vector.broadcast %40 : vector<8x1xf32> to vector<8x8xf32>
    %42 = arith.subf %38, %41 : vector<8x8xf32>
    %43 = math.exp %42 : vector<8x8xf32>
    %cst_23 = arith.constant dense<0.000000e+00> : vector<8xf32>
    %44 = vector.multi_reduction <add>, %43, %cst_23 [1] : vector<8x8xf32> to vector<8xf32>
    %45 = vector.shape_cast %44 : vector<8xf32> to vector<8x1xf32>
    %cst_24 = arith.constant 1.000000e+00 : f32
    %46 = vector.broadcast %cst_24 : f32 to vector<8x1xf32>
    %47 = arith.divf %46, %45 : vector<8x1xf32>
    %48 = vector.broadcast %47 : vector<8x1xf32> to vector<8x8xf32>
    %49 = arith.mulf %43, %48 : vector<8x8xf32>
    %50 = arith.truncf %49 : vector<8x8xf32> to vector<8x8xbf16>
    %c0_25 = arith.constant 0 : index
    %c1 = arith.constant 1 : index
    %c0_26 = arith.constant 0 : index
    %c0_27 = arith.constant 0 : index
    %51 = vector.load %arg7[%c0_25, %c1, %c0_26, %c0_27] : memref<1x4x8x8xbf16, #tpu.memory_space<vmem>>, vector<1x1x8x8xbf16>
    %52 = vector.shape_cast %51 : vector<1x1x8x8xbf16> to vector<8x8xbf16>
    %53 = vector.shape_cast %50 : vector<8x8xbf16> to vector<1x1x8x8xbf16>
    tpu.vector_store %arg7[%c0_25, %c1, %c0_26, %c0_27], %53 {strides = array<i32>} : memref<1x4x8x8xbf16, #tpu.memory_space<vmem>>, vector<1x1x8x8xbf16>,
    %54 = arith.truncf %49 : vector<8x8xf32> to vector<8x8xbf16>
    %cst_28 = arith.constant dense<0.000000e+00> : vector<8x8xf32>
    %55 = tpu.matmul %54, %35, %cst_28 {dimension_numbers = #tpu.dot_dimension_numbers<[1], [0], [0], [1], [0, 0, 1, 1], [], []>} : vector<8x8xbf16>, vector<8x8xbf16>, vector<8x8xf32> -> vector<8x8xf32>
    %56 = vector.extract_strided_slice %1 {offsets = [0, 16], sizes = [8, 8], strides = [1, 1]} : vector<8x32xbf16> to vector<8x8xbf16>
    %57 = vector.extract_strided_slice %3 {offsets = [0, 16], sizes = [8, 8], strides = [1, 1]} : vector<8x32xbf16> to vector<8x8xbf16>
    %58 = vector.extract_strided_slice %5 {offsets = [0, 16], sizes = [8, 8], strides = [1, 1]} : vector<8x32xbf16> to vector<8x8xbf16>
    %cst_29 = arith.constant dense<0.000000e+00> : vector<8x8xf32>
    %59 = tpu.matmul %56, %57, %cst_29 {dimension_numbers = #tpu.dot_dimension_numbers<[1], [1], [0], [0], [0, 0, 1, 0], [], []>} : vector<8x8xbf16>, vector<8x8xbf16>, vector<8x8xf32> -> vector<8x8xf32>
    %cst_30 = arith.constant -1.000000e+09 : f32
    %60 = vector.broadcast %cst_30 : f32 to vector<8x8xf32>
    %61 = arith.select %9, %60, %59 : vector<8x8xi1>, vector<8x8xf32>
    %cst_31 = arith.constant dense<0xFF800000> : vector<8xf32>
    %62 = vector.multi_reduction <maximumf>, %61, %cst_31 [1] : vector<8x8xf32> to vector<8xf32>
    %63 = vector.shape_cast %62 : vector<8xf32> to vector<8x1xf32>
    %64 = vector.broadcast %63 : vector<8x1xf32> to vector<8x8xf32>
    %65 = arith.subf %61, %64 : vector<8x8xf32>
    %66 = math.exp %65 : vector<8x8xf32>
    %cst_32 = arith.constant dense<0.000000e+00> : vector<8xf32>
    %67 = vector.multi_reduction <add>, %66, %cst_32 [1] : vector<8x8xf32> to vector<8xf32>
    %68 = vector.shape_cast %67 : vector<8xf32> to vector<8x1xf32>
    %cst_33 = arith.constant 1.000000e+00 : f32
    %69 = vector.broadcast %cst_33 : f32 to vector<8x1xf32>
    %70 = arith.divf %69, %68 : vector<8x1xf32>
    %71 = vector.broadcast %70 : vector<8x1xf32> to vector<8x8xf32>
    %72 = arith.mulf %66, %71 : vector<8x8xf32>
    %73 = arith.truncf %72 : vector<8x8xf32> to vector<8x8xbf16>
    %c0_34 = arith.constant 0 : index
    %c2 = arith.constant 2 : index
    %c0_35 = arith.constant 0 : index
    %c0_36 = arith.constant 0 : index
    %74 = vector.load %arg7[%c0_34, %c2, %c0_35, %c0_36] : memref<1x4x8x8xbf16, #tpu.memory_space<vmem>>, vector<1x1x8x8xbf16>
    %75 = vector.shape_cast %74 : vector<1x1x8x8xbf16> to vector<8x8xbf16>
    %76 = vector.shape_cast %73 : vector<8x8xbf16> to vector<1x1x8x8xbf16>
    tpu.vector_store %arg7[%c0_34, %c2, %c0_35, %c0_36], %76 {strides = array<i32>} : memref<1x4x8x8xbf16, #tpu.memory_space<vmem>>, vector<1x1x8x8xbf16>,
    %77 = arith.truncf %72 : vector<8x8xf32> to vector<8x8xbf16>
    %cst_37 = arith.constant dense<0.000000e+00> : vector<8x8xf32>
    %78 = tpu.matmul %77, %58, %cst_37 {dimension_numbers = #tpu.dot_dimension_numbers<[1], [0], [0], [1], [0, 0, 1, 1], [], []>} : vector<8x8xbf16>, vector<8x8xbf16>, vector<8x8xf32> -> vector<8x8xf32>
    %79 = vector.extract_strided_slice %1 {offsets = [0, 24], sizes = [8, 8], strides = [1, 1]} : vector<8x32xbf16> to vector<8x8xbf16>
    %80 = vector.extract_strided_slice %3 {offsets = [0, 24], sizes = [8, 8], strides = [1, 1]} : vector<8x32xbf16> to vector<8x8xbf16>
    %81 = vector.extract_strided_slice %5 {offsets = [0, 24], sizes = [8, 8], strides = [1, 1]} : vector<8x32xbf16> to vector<8x8xbf16>
    %cst_38 = arith.constant dense<0.000000e+00> : vector<8x8xf32>
    %82 = tpu.matmul %79, %80, %cst_38 {dimension_numbers = #tpu.dot_dimension_numbers<[1], [1], [0], [0], [0, 0, 1, 0], [], []>} : vector<8x8xbf16>, vector<8x8xbf16>, vector<8x8xf32> -> vector<8x8xf32>
    %cst_39 = arith.constant -1.000000e+09 : f32
    %83 = vector.broadcast %cst_39 : f32 to vector<8x8xf32>
    %84 = arith.select %9, %83, %82 : vector<8x8xi1>, vector<8x8xf32>
    %cst_40 = arith.constant dense<0xFF800000> : vector<8xf32>
    %85 = vector.multi_reduction <maximumf>, %84, %cst_40 [1] : vector<8x8xf32> to vector<8xf32>
    %86 = vector.shape_cast %85 : vector<8xf32> to vector<8x1xf32>
    %87 = vector.broadcast %86 : vector<8x1xf32> to vector<8x8xf32>
    %88 = arith.subf %84, %87 : vector<8x8xf32>
    %89 = math.exp %88 : vector<8x8xf32>
    %cst_41 = arith.constant dense<0.000000e+00> : vector<8xf32>
    %90 = vector.multi_reduction <add>, %89, %cst_41 [1] : vector<8x8xf32> to vector<8xf32>
    %91 = vector.shape_cast %90 : vector<8xf32> to vector<8x1xf32>
    %cst_42 = arith.constant 1.000000e+00 : f32
    %92 = vector.broadcast %cst_42 : f32 to vector<8x1xf32>
    %93 = arith.divf %92, %91 : vector<8x1xf32>
    %94 = vector.broadcast %93 : vector<8x1xf32> to vector<8x8xf32>
    %95 = arith.mulf %89, %94 : vector<8x8xf32>
    %96 = arith.truncf %95 : vector<8x8xf32> to vector<8x8xbf16>
    %c0_43 = arith.constant 0 : index
    %c3 = arith.constant 3 : index
    %c0_44 = arith.constant 0 : index
    %c0_45 = arith.constant 0 : index
    %97 = vector.load %arg7[%c0_43, %c3, %c0_44, %c0_45] : memref<1x4x8x8xbf16, #tpu.memory_space<vmem>>, vector<1x1x8x8xbf16>
    %98 = vector.shape_cast %97 : vector<1x1x8x8xbf16> to vector<8x8xbf16>
    %99 = vector.shape_cast %96 : vector<8x8xbf16> to vector<1x1x8x8xbf16>
    tpu.vector_store %arg7[%c0_43, %c3, %c0_44, %c0_45], %99 {strides = array<i32>} : memref<1x4x8x8xbf16, #tpu.memory_space<vmem>>, vector<1x1x8x8xbf16>,
    %100 = arith.truncf %95 : vector<8x8xf32> to vector<8x8xbf16>
    %cst_46 = arith.constant dense<0.000000e+00> : vector<8x8xf32>
    %101 = tpu.matmul %100, %81, %cst_46 {dimension_numbers = #tpu.dot_dimension_numbers<[1], [0], [0], [1], [0, 0, 1, 1], [], []>} : vector<8x8xbf16>, vector<8x8xbf16>, vector<8x8xf32> -> vector<8x8xf32>
    %102 = tpu.concatenate %32, %55, %78, %101 in 1 : vector<8x8xf32>, vector<8x8xf32>, vector<8x8xf32>, vector<8x8xf32> -> vector<8x32xf32>
    %103 = arith.truncf %102 : vector<8x32xf32> to vector<8x32xbf16>
    %c0_47 = arith.constant 0 : index
    %c0_48 = arith.constant 0 : index
    %c0_49 = arith.constant 0 : index
    %104 = vector.load %arg6[%c0_47, %c0_48, %c0_49] : memref<1x8x32xbf16, #tpu.memory_space<vmem>>, vector<1x8x32xbf16>
    %105 = vector.shape_cast %104 : vector<1x8x32xbf16> to vector<8x32xbf16>
    %106 = vector.shape_cast %103 : vector<8x32xbf16> to vector<1x8x32xbf16>
    tpu.vector_store %arg6[%c0_47, %c0_48, %c0_49], %106 {strides = array<i32>} : memref<1x8x32xbf16, #tpu.memory_space<vmem>>, vector<1x8x32xbf16>,
    return
  }
  func.func @transform_0(%arg0: i32, %arg1: i32) -> (i32, i32, i32) {
    %c0_i32 = arith.constant 0 : i32
    %c0_i32_0 = arith.constant 0 : i32
    return %arg0, %arg1, %c0_i32 : i32, i32, i32
  }
  func.func @transform_1(%arg0: i32, %arg1: i32) -> (i32, i32, i32) {
    %c0_i32 = arith.constant 0 : i32
    %c0_i32_0 = arith.constant 0 : i32
    %c0_i32_1 = arith.constant 0 : i32
    return %arg0, %c0_i32, %c0_i32_0 : i32, i32, i32
  }
  func.func @transform_2(%arg0: i32, %arg1: i32) -> (i32, i32, i32) {
    %c0_i32 = arith.constant 0 : i32
    %c0_i32_0 = arith.constant 0 : i32
    %c0_i32_1 = arith.constant 0 : i32
    return %arg0, %c0_i32, %c0_i32_0 : i32, i32, i32
  }
  func.func @transform_3(%arg0: i32, %arg1: i32) -> (i32, i32, i32) {
    %c0_i32 = arith.constant 0 : i32
    %c0_i32_0 = arith.constant 0 : i32
    return %arg0, %arg1, %c0_i32 : i32, i32, i32
  }
  func.func @transform_4(%arg0: i32, %arg1: i32) -> (i32, i32, i32) {
    %c0_i32 = arith.constant 0 : i32
    %c0_i32_0 = arith.constant 0 : i32
    return %arg0, %arg1, %c0_i32 : i32, i32, i32
  }
  func.func @transform_5(%arg0: i32, %arg1: i32) -> (i32, i32, i32, i32) {
    %c0_i32 = arith.constant 0 : i32
    %c0_i32_0 = arith.constant 0 : i32
    %c0_i32_1 = arith.constant 0 : i32
    return %arg0, %c0_i32, %arg1, %c0_i32_0 : i32, i32, i32, i32
  }
}

</mosaic_0001>

<bundles_post_ra>
// kernel: mha_forward.5
= control target key start
LH: loop header
LB: loop body
LE: loop exit
PB: predicated region body
PF: predicated region fallthrough
CT: control target
= control target key end

     0   :  { %vm16_vm0 = vcmask 261120   ;;  %v137_v0 = vmov 0.0   ;;  %vm138_vm1 = vmmov 0   ;;  %vm106_vm2 = vcmask 257024   ;;  %s174_s1 = inlined_call_operand.vmem [shape: bf16[32,32], index: 1, kind: input, shape index: {}]   ;;  %s175_s0 = inlined_call_operand.vmem [shape: bf16[16,32], index: 0, kind: input, shape index: {}]   ;;  %s176_s2 = inlined_call_operand.vmem [shape: bf16[16,32], index: 2, kind: output, shape index: {}]  }
   0x1   :  { %124 = vmatprep.subr.bf16.mxu0 %v137_v0  ;;  %v134_v1 = vld [vmem:[%s174_s1 + $0x8] sm:$0xff]   ;;  %128 = vmatprep.mubr.msk.bf16.mxu0 %vm138_vm1, %v137_v0  ;;  %17 = vst.msk [vmem:[#allocation2] sm:$0xff] %vm16_vm0, %v137_v0  ;;  %18 = vst.msk [vmem:[#allocation2 + $0x8] sm:$0xff] %vm16_vm0, %v137_v0  ;;  %v135_v2 = vld [vmem:[%s174_s1] sm:$0xff]  }
   0x2   :  { %125 = vmatpush3.bf16.msra.mxu0 %v134_v1  ;;  %v136_v3 = vld [vmem:[%s175_s0] sm:$0xff]  }
   0x3   :  { %126 = vmatprep.subr.bf16.mxu0 %v137_v0 }
   0x6   :  { %127 = vmatpush3.bf16.msra.mxu0 %v135_v2 }
   0x8   :  { %v19_v4 = vld [vmem:[#allocation2] sm:$0xff]  ;;  %v20_v8 = vld [vmem:[#allocation2 + $0x8] sm:$0xff] }
   0x9   :  { %129 = vmatmul.mubr.msk.bf16.vlgmr.msra.gmra.mxu0 %vm16_vm0, %v136_v3 }
  0xc9   :  { %v82_v5 = vpop.f32.mrf.mxu0 }
  0xca   :  { %v89_v6 = vadd.f32 %v82_v5, %v19_v4 }
  0xcb   :  { %v130_v7 = vpop.f32.mrf.mxu0 }
  0xcc   :  { %91 = vst.msk [vmem:[#allocation2] sm:$0xff] %vm16_vm0, %v89_v6 }
  0xcd   :  { %v85_v9 = vpop.f32.mrf.mxu0 }
  0xce   :  { %v90_v10 = vadd.f32 %v85_v9, %v20_v8 }
  0xcf   :  { %v131_v11 = vpop.f32.mrf.mxu0 }
  0xd0   :  { %92 = vst.msk [vmem:[#allocation2 + $0x8] sm:$0xff] %vm16_vm0, %v90_v10 }
  0xd3   :  { %v96_v12 = vld [vmem:[#allocation2] sm:$0xff] }
  0xd4   :  { %v119_v13 = vpack.c.bf16 %v96_v12, %v96_v12 }
  0xd6   :  { %107 = vst.msk [vmem:[%s176_s2] sm:$0xf] %vm106_vm2, %v119_v13 }
  0xd7   :  { %v97_v14 = vld [vmem:[#allocation2 + $0x8] sm:$0xff] }
  0xd8   :  { %v120_v15 = vpack.c.bf16 %v97_v14, %v97_v14 }
  0xda   :  { %108 = vst.msk [vmem:[%s176_s2 + $0x4] sm:$0xf] %vm106_vm2, %v120_v15 }

// kernel: mha_forward.9
= control target key start
LH: loop header
LB: loop body
LE: loop exit
PB: predicated region body
PF: predicated region fallthrough
CT: control target
= control target key end

     0   :  { %v200_v1 = vmov 0.0   ;;  %vm201_vm0 = vmmov 0   ;;  %vm20_vm1 = vcmask 261120   ;;  %s254_s0 = inlined_call_operand.vmem [shape: bf16[16,32], index: 0, kind: input, shape index: {}]   ;;  %s255_s1 = inlined_call_operand.vmem [shape: bf16[32,32], index: 1, kind: input, shape index: {}]   ;;  %s256_s2 = inlined_call_operand.vmem [shape: f32[16,32], index: 2, kind: input, shape index: {}]   ;;  %s257_s3 = inlined_call_operand.hbm [shape: f32[16,32], index: 3, kind: output, shape index: {}]  }
   0x1   :  { %v171_v0 = vld [vmem:[%s255_s1 + $0x8] sm:$0xff]   ;;  %158 = vmatprep.subr.bf16.mxu0 %v200_v1  ;;  %v172_v2 = vld [vmem:[%s255_s1] sm:$0xff]   ;;  %162 = vmatprep.mubr.msk.bf16.mxu0 %vm201_vm0, %v200_v1  ;;  %21 = vst.msk [vmem:[#allocation2] sm:$0xff] %vm20_vm1, %v200_v1  ;;  %22 = vst.msk [vmem:[#allocation2 + $0x8] sm:$0xff] %vm20_vm1, %v200_v1 }
   0x2   :  { %159 = vmatpush3.bf16.msra.mxu0 %v171_v0 }
   0x3   :  { %160 = vmatprep.subr.bf16.mxu0 %v200_v1 }
   0x4   :  { %8 = vsyncpa [#allocation4], 0  ;;  %v173_v3 = vld [vmem:[%s254_s0] sm:$0xff]   ;;  %v103_v15 = vld [vmem:[%s256_s2 + $0x8] sm:$0xff] }
   0x5   :  { %v102_v12 = vld [vmem:[%s256_s2] sm:$0xff]  ;;  %s202_s2 = smov [#allocation3]  }
   0x6   :  { %161 = vmatpush3.bf16.msra.mxu0 %v172_v2  ;;  %s140_s20 = sshll.u32 %s202_s2, 4  ;;  %s141_s20 = int_to_ptr.vmem [resolvable:$true] %s140_s20 }
   0x7   :  { %s178_s21 = scalar_lea.vmem %s141_s20, 256  ;;  %p183_p1 = scmp.lt.s32.totalorder %s141_s20, %s141_s20 }
   0x8   :  { %v23_v4 = vld [vmem:[#allocation2] sm:$0xff]  ;;  %v24_v8 = vld [vmem:[#allocation2 + $0x8] sm:$0xff]  ;;  %p179_p0 = scmp.ne.s32.totalorder %s141_s20, %s178_s21  ;;  %p184_p2 = scmp.lt.s32.totalorder %s178_s21, %s178_s21 }
   0x9   :  { %163 = vmatmul.mubr.msk.bf16.vlgmr.msra.gmra.mxu0 %vm20_vm1, %v173_v3 }
   0xa   :  { %p185_p3 = por %p184_p2, %p183_p1 }
   0xc   :  { %p186_p4 = pnand %p185_p3, %p179_p0 }
  0xc9   :  { %v86_v5 = vpop.f32.mrf.mxu0 }
  0xca   :  { %v93_v6 = vadd.f32 %v86_v5, %v23_v4 }
  0xcb   :  { %v164_v7 = vpop.f32.mrf.mxu0 }
  0xcc   :  { %95 = vst.msk [vmem:[#allocation2] sm:$0xff] %vm20_vm1, %v93_v6 }
  0xcd   :  { %v89_v9 = vpop.f32.mrf.mxu0 }
  0xce   :  { %v94_v10 = vadd.f32 %v89_v9, %v24_v8 }
  0xcf   :  { %v165_v11 = vpop.f32.mrf.mxu0 }
  0xd0   :  { %96 = vst.msk [vmem:[#allocation2 + $0x8] sm:$0xff] %vm20_vm1, %v94_v10 }
  0xd3   :  { %v100_v13 = vld [vmem:[#allocation2] sm:$0xff] }
  0xd4   :  { %v104_v14 = vadd.f32 %v102_v12, %v100_v13 }
  0xd6   :  { %v106_v16 = vsel %vm20_vm1, %v104_v14, 0.0 }
  0xd7   :  { %107 = vadd.xlane.f32.xlu0 %v106_v16  ;;  %v101_v17 = vld [vmem:[#allocation2 + $0x8] sm:$0xff] }
  0xd8   :  { %v105_v18 = vadd.f32 %v103_v15, %v101_v17 }
  0xda   :  { %v109_v19 = vsel %vm20_vm1, %v105_v18, 0.0 }
  0xdb   :  { %110 = vadd.xlane.f32.xlu0 %v109_v19 }
 0x160   :  { %v108_v20 = vpop.xlane.xlu0 %107 }
 0x161   :  { %v113_v21 = vmul.f32 0.03125, %v108_v20 }
 0x163   :  { %v115_v22 = vsub.f32 %v104_v14, %v113_v21 }
 0x164   :  { %v111_v23 = vpop.xlane.xlu0 %110 }
 0x165   :  { %v114_v24 = vmul.f32 0.03125, %v111_v23  ;;  %v117_v25 = vmul.f32 %v115_v22, %v115_v22 }
 0x167   :  { %v116_v26 = vsub.f32 %v105_v18, %v114_v24  ;;  %v119_v27 = vsel %vm20_vm1, %v117_v25, 0.0 }
 0x168   :  { %120 = vadd.xlane.f32.xlu1 %v119_v27 }
 0x169   :  { %v118_v28 = vmul.f32 %v116_v26, %v116_v26 }
 0x16b   :  { %v122_v29 = vsel %vm20_vm1, %v118_v28, 0.0 }
 0x16c   :  { %123 = vadd.xlane.f32.xlu1 %v122_v29 }
 0x1f1   :  { %v121_v30 = vpop.xlane.xlu1 %120 }
 0x1f2   :  { %v125_v31 = vmul.f32 0.03125, %v121_v30 }
 0x1f4   :  { %v127_v32 = vadd.f32 1e-05, %v125_v31 }
 0x1f5   :  { %v124_v33 = vpop.xlane.xlu1 %123 }
 0x1f6   :  { %174 = vrsqrt.f32 %v127_v32  ;;  %v126_v34 = vmul.f32 0.03125, %v124_v33 }
 0x1f8   :  { %v128_v35 = vadd.f32 1e-05, %v126_v34 }
 0x1fa   :  { %176 = vrsqrt.f32 %v128_v35 }
 0x203   :  { %v175_v36 = vpop.eup %174 }
 0x204   :  { %v131_v37 = vmul.f32 %v175_v36, %v115_v22 }
 0x206   :  { %133 = vst.msk [vmem:[#allocation3] sm:$0xff] %vm20_vm1, %v131_v37 }
 0x207   :  { %v177_v38 = vpop.eup %176 }
 0x208   :  { %v132_v39 = vmul.f32 %v177_v38, %v116_v26 }
 0x20a   :  { %134 = vst.msk [vmem:[#allocation3 + $0x8] sm:$0xff] %vm20_vm1, %v132_v39 }
 0x20b   :  { %189 = shalt.err (!%p186_p4)
}
 0x20c   :  { %s203_s22 = smov 128   ;;  %s204_s23 = smov 8  }
 0x20d   :  { %146 = dma.vmem_to_hbm [thread:$0]  %s141_s20, 256, %s257_s3, [#allocation4], %s203_s22, %s203_s22, %s204_s23  }
 0x20e   :  { %198 = dma.done.wait [#allocation4], 256  }
 0x20f   :  { %199 = vsyncadd [#allocation4], 4294967040 }
 0x210   :  { %150 = vsyncpa [#allocation4], 1 }

// kernel: mha_forward.8
= control target key start
LH: loop header
LB: loop body
LE: loop exit
PB: predicated region body
PF: predicated region fallthrough
CT: control target
= control target key end

     0   :  { %11 = vsyncpa [#allocation3], 0  ;;  %s1513_s0 = inlined_call_operand.vmem [shape: bf16[2,8,32], index: 0, kind: input, shape index: {}]   ;;  %s1514_s1 = inlined_call_operand.vmem [shape: bf16[2,8,32], index: 1, kind: input, shape index: {}]   ;;  %s1515_s2 = inlined_call_operand.vmem [shape: bf16[2,8,32], index: 2, kind: input, shape index: {}]   ;;  %s1516_s3 = inlined_call_operand.vmem [shape: s8[2,8,8], index: 3, kind: input, shape index: {}]   ;;  %s1517_s4 = inlined_call_operand.vmem [shape: bf16[2,8,32], index: 4, kind: output, shape index: {0}]   ;;  %s1518_s5 = inlined_call_operand.hbm [shape: bf16[2,4,8,8], index: 5, kind: output, shape index: {1}]  }
   0x1   :  { %13 = vsyncpa [#allocation3 + $0x1], 0  ;;  %s1288_s18 = smov 0   ;;  %s1290_s19 = smov 0  }
   0x2   :  { %s1292_s20 = smov 0   ;;  %s1294_s21 = smov 0  }
   0x3   :  { %s1296_s22 = smov 0   ;;  %s1298_s23 = smov 0  }
   0x4 LB: > { %s988_s24 = sadd.s32 4294967295, %s1244_s23   ;;  %s989_s25 = sadd.s32 4294967294, %s1244_s23   ;;  %s1244_s23 = sphi %s1298_s23, %s19_s23   ;;  %s1240_s22 = sphi %s1296_s22, %s1527_s22   ;;  %s1236_s21 = sphi %s1294_s21, %s1526_s21   ;;  %s1232_s20 = sphi %s1292_s20, %s1525_s20   ;;  %s1228_s19 = sphi %s1290_s19, %s1524_s19   ;;  %s1224_s18 = sphi %s1288_s18, %s1523_s18  }
   0x5   : > { %s31_s26 = sadd.s32 1, %s1240_s22  ;;  %s176_s27 = sadd.s32 1, %s1232_s20 }
   0x6   : > { %p33_p0 = scmp.ge.s32.totalorder %s31_s26, 2  ;;  %p186_p1 = scmp.ne.s32.totalorder %s1232_s20, %s1228_s19 }
   0x7   : > { %p187_p2 = scmp.eq.s32.totalorder %s988_s24, 1  ;;  %p192_p3 = scmp.ne.s32.totalorder %s1228_s19, %s1224_s18 }
   0x8   : > { %s1529_s26 = smov (%p33_p0, %s31_s26), 0  ;;  %p193_p5 = scmp.eq.s32.totalorder %s989_s25, 1 }
   0x9   : > { %p1328_p4 = por %p187_p2, %p186_p1  ;;  %s171_s29 = ssub.s32 %s1240_s22, %s1529_s26 }
   0xa   : > { %p992_p6 = scmp.ge.s32.totalorder %s1244_s23, 1  ;;  %p174_p7 = scmp.eq.s32.totalorder %s171_s29, 0 }
   0xb   : > { %p1335_p8 = por %p193_p5, %p192_p3  ;;  %p245_p9 = scmp.lt.s32.totalorder %s1244_s23, 3 }
   0xc   : > { %s1341_s6 = scalar_select %p174_p7, %s1232_s20, %s176_s27  }
   0xd   : > { %p246_p10 = pnand %p992_p6, %p245_p9 }
   0xe   : > { %p297_p11 = scmp.lt.s32.totalorder (!%p246_p10), %s1236_s21, 1  ;;  %s1249_s25 = smov (!%p246_p10), 120  }
   0xf   : > { %249 = sbr.rel (%p246_p10) target bundleno = 1422 (0x58e), region = 36  ;;  %s1250_s27 = smov (!%p246_p10), 112  }
  0x10   : > { %s1251_s29 = smov (!%p246_p10), 104   ;;  %s1018_s16 = sshll.u32 (!%p246_p10), %s1236_s21, 8 }
  0x14   : > { %v1246_v0 = vmov 0.0   ;;  %vm1247_vm0 = vmmov 0   ;;  %s298_s7 = scalar_select %p297_p11, %s1236_s21, 1  ;;  %vm334_vm1 = vcmask 64512   ;;  %v1248_v5 = vmov 0  }
  0x15   : > { %1035 = vmatprep.subr.bf16.mxu0 %v1246_v0  ;;  %1037 = vmatprep.mubr.msk.bf16.mxu0 %vm1247_vm0, %v1246_v0  ;;  %vm403_vm4 = vcmask 1043456   ;;  %vm398_vm5 = vcmask 60416   ;;  %s1254_s21 = smov [#allocation2]  }
  0x16   : > { %1041 = vmatprep.subr.bf16.mxu1 %v1246_v0  ;;  %1043 = vmatprep.mubr.msk.bf16.mxu1 %vm1247_vm0, %v1246_v0  ;;  %s1351_s8 = sshll.u32 %s298_s7, 2  ;;  %s997_s15 = sshll.u32 %s298_s7, 1 }
  0x17   : > { %s307_s11 = scalar_lea.vmem %s1514_s1, %s1351_s8  ;;  %s303_s14 = scalar_lea.vmem %s1513_s0, %s1351_s8 }
  0x18   : > { %v330_v1 = vld [vmem:[%s307_s11] sm:$0xf]  ;;  %s318_s24 = scalar_lea.vmem %s1516_s3, %s997_s15  ;;  %s311_s10 = scalar_lea.vmem %s1515_s2, %s1351_s8 }
  0x19   : > { %v339_v2 = vsel %vm334_vm1, %v330_v1, 0  ;;  %v329_v3 = vld [vmem:[%s303_s14] sm:$0xf]  ;;  %v1002_v15 = vcombine.low %v330_v1, %v330_v1  ;;  %s294_s11 = sand.u32 1, %s1228_s19   ;;  %s1252_s14 = smov 8  }
  0x1a   : > { %1036 = vmatpush3.bf16.xpose.msra.mxu0 %v339_v2  ;;  %v332_v4 = vld [vmem:[%s318_s24] sm:$0x3]  ;;  %v1001_v16 = vcombine.low %v329_v3, %v329_v3  ;;  %s993_s12 = sshll.u32 %s294_s11, 4  ;;  %s1253_s15 = smov 16  }
  0x1b   : > { %1053 = vmatprep.subr.bf16.mxu0 %v1246_v0  ;;  %vm333_vm2 = vnez %v332_v4  ;;  %455 = vrot.lane.b32.xlu1 %v1002_v15, %s1249_s25  ;;  %v1386_v22 = vld [vmem:[%s311_s10] sm:$0xf]  ;;  %s1396_s13 = scalar_lea.vmem [#allocation2], %s993_s12  ;;  %s1172_s9 = sshll.u32 %s1254_s21, 4  ;;  %s1173_s9 = int_to_ptr.vmem [resolvable:$false] %s1172_s9 }
  0x1c   : > { %v381_v6 = vsel %vm333_vm2, 16843009, %v1248_v5  ;;  %v405_v23 = vsel %vm403_vm4, %v1386_v22, 0  ;;  %s843_s17 = sshll.u32 %s1396_s13, 4  ;;  %s1174_s10 = scalar_lea.vmem %s1173_s9, 512  ;;  %s1458_s17 = int_to_ptr.vmem [resolvable:$true] %s843_s17 }
  0x1d   : > { %v382_v7 = vunpack.c.0.s8 %v381_v6  ;;  %1042 = vmatpush3.bf16.msra.mxu1 %v405_v23  ;;  %v1005_v6 = vcombine.low %v1386_v22, %v1386_v22  ;;  %s1168_s7 = scalar_lea.vmem %s1458_s17, 256  ;;  %p1175_p1 = scmp.lt.s32.totalorder %s1458_s17, %s1173_s9 }
  0x1e   : > { %1047 = vmatprep.subr.bf16.mxu1 %v1246_v0  ;;  %p1169_p12 = scmp.ne.s32.totalorder %s1458_s17, %s1168_s7  ;;  %p1176_p2 = scmp.lt.s32.totalorder %s1174_s10, %s1168_s7 }
  0x1f   : > { %vm1369_vm3 = vcmp.ne.s32.totalorder %v382_v7, 0  ;;  %450 = vrot.lane.b32.xlu1 %v1001_v16, %s1249_s25 }
  0x20   : > { %p1170_p13 = pnand %p1169_p12, %p1328_p4  ;;  %p1177_p3 = por %p1176_p2, %p1175_p1 }
  0x21   : > { %1038 = vmatmul.mubr.msk.bf16.vlgmr.msra.gmra.mxu0 %vm334_vm1, %v329_v3 }
  0x22   : > { %1055 = vmatprep.mubr.msk.bf16.mxu0 %vm1247_vm0, %v1246_v0  ;;  %p1171_p0 = pneg %p1170_p13 }
  0x23   : > { %570 = vrot.lane.b32.xlu1 %v1001_v16, %s1250_s27 }
  0x24   : > { %p1178_p5 = pnand %p1177_p3, %p1171_p0 }
  0x27   : > { %686 = vrot.lane.b32.xlu1 %v1002_v15, %s1251_s29 }
  0x2b   : > { %684 = vrot.lane.b32.xlu1 %v1001_v16, %s1251_s29 }
  0x8d   : > { %v456_v26 = vpop.permute.xlu1 %455 }
  0x8e   : > { %v461_v28 = vsel %vm334_vm1, %v456_v26, 0 }
  0x91   : > { %v451_v30 = vpop.permute.xlu1 %450 }
  0x95   : > { %v571_v32 = vpop.permute.xlu1 %570 }
  0x99   : > { %v687_v34 = vpop.permute.xlu1 %686 }
  0x9a   : > { %v692_v35 = vsel %vm334_vm1, %v687_v34, 0 }
  0x9d   : > { %v685_v36 = vpop.permute.xlu1 %684 }
  0xe1   : > { %v375_v9 = vpop.f32.mrf.mxu0 }
  0xe2   : > { %v384_v10 = vsel %vm1369_vm3, -1e+09, %v375_v9 }
  0xe3   : > { %v1039_v11 = vpop.f32.mrf.mxu0  ;;  %v385_v12 = vsel %vm334_vm1, %v384_v10, -inf }
  0xe4   : > { %386 = vmax.xlane.f32.xlu0 %v385_v12 }
  0xe5   : > { %v378_v13 = vpop.f32.mrf.mxu0 }
  0xe7   : > { %v1040_v14 = vpop.f32.mrf.mxu0 }
 0x16d   : > { %v387_v17 = vpop.xlane.xlu0 %386 }
 0x16e   : > { %v388_v18 = vsub.f32 %v384_v10, %v387_v17 }
 0x170   : > { %v389_v19 = vmul.f32 1.442695, %v388_v18 }
 0x172   : > { %1152 = vpow2.f32 %v389_v19 }
 0x17f   : > { %v1153_v20 = vpop.eup %1152 }
 0x180   : > { %v391_v21 = vsel %vm334_vm1, %v1153_v20, 0.0 }
 0x181   : > { %392 = vadd.xlane.f32.xlu0 %v391_v21 }
 0x197   : > { %572 = vrot.lane.b32.xlu0 %v1002_v15, %s1250_s27 }
 0x20a   : > { %v393_v24 = vpop.xlane.xlu0 %392 }
 0x20b   : > { %1154 = vrcp.f32 %v393_v24 }
 0x20e   : > { %v573_v31 = vpop.permute.xlu0 %572 }
 0x20f   : > { %v578_v33 = vsel %vm334_vm1, %v573_v31, 0 }
 0x218   : > { %v1155_v25 = vpop.eup %1154 }
 0x219   : > { %v396_v27 = vmul.f32 %v1155_v25, %v1153_v20 }
 0x21b   : > { %v397_v29 = vpack.c.bf16 %v396_v27, %v396_v27 }
 0x21d   : > { %399 = vst.msk [vmem:[%s1396_s13] sm:$0xf] %vm398_vm5, %v397_v29  ;;  %1044 = vmatmul.mubr.msk.bf16.vlgmr.msra.gmra.mxu1 %vm334_vm1, %v397_v29 }
 0x21e   : > { %1048 = vmatpush3.bf16.xpose.msra.mxu1 %v461_v28  ;;  %1049 = vmatprep.mubr.msk.bf16.mxu1 %vm1247_vm0, %v1246_v0 }
 0x21f   : > { %1059 = vmatprep.subr.bf16.mxu1 %v1246_v0 }
 0x225   : > { %1050 = vmatmul.mubr.msk.bf16.vlgmr.msra.gmra.mxu1 %vm334_vm1, %v451_v30 }
 0x226   : > { %1060 = vmatpush3.bf16.xpose.msra.mxu1 %v578_v33  ;;  %1061 = vmatprep.mubr.msk.bf16.mxu1 %vm1247_vm0, %v1246_v0 }
 0x227   : > { %1071 = vmatprep.subr.bf16.mxu1 %v1246_v0 }
 0x22d   : > { %1062 = vmatmul.mubr.msk.bf16.vlgmr.msra.gmra.mxu1 %vm334_vm1, %v571_v32 }
 0x22e   : > { %1072 = vmatpush3.bf16.xpose.msra.mxu1 %v692_v35  ;;  %1073 = vmatprep.mubr.msk.bf16.mxu1 %vm1247_vm0, %v1246_v0 }
 0x235   : > { %1074 = vmatmul.mubr.msk.bf16.vlgmr.msra.gmra.mxu1 %vm334_vm1, %v685_v36 }
 0x2dd   : > { %v1414_v37 = vpop.f32.mrf.mxu1 }
 0x2df   : > { %v1045_v38 = vpop.f32.mrf.mxu1 }
 0x2e1   : > { %v444_v39 = vpop.f32.mrf.mxu1 }
 0x2e3   : > { %v1046_v40 = vpop.f32.mrf.mxu1 }
 0x2e5   : > { %v497_v41 = vpop.f32.mrf.mxu1 }
 0x2e6   : > { %v503_v42 = vsel %vm1369_vm3, -1e+09, %v497_v41 }
 0x2e7   : > { %v1051_v43 = vpop.f32.mrf.mxu1  ;;  %v504_v44 = vsel %vm334_vm1, %v503_v42, -inf }
 0x2e8   : > { %505 = vmax.xlane.f32.xlu1 %v504_v44 }
 0x2e9   : > { %v500_v45 = vpop.f32.mrf.mxu1 }
 0x2eb   : > { %v1052_v46 = vpop.f32.mrf.mxu1 }
 0x2ed   : > { %v614_v47 = vpop.f32.mrf.mxu1 }
 0x2ee   : > { %v620_v48 = vsel %vm1369_vm3, -1e+09, %v614_v47 }
 0x2ef   : > { %v1063_v49 = vpop.f32.mrf.mxu1  ;;  %v621_v50 = vsel %vm334_vm1, %v620_v48, -inf }
 0x2f0   : > { %622 = vmax.xlane.f32.xlu0 %v621_v50 }
 0x2f1   : > { %v617_v51 = vpop.f32.mrf.mxu1 }
 0x2f3   : > { %v1064_v52 = vpop.f32.mrf.mxu1 }
 0x2f5   : > { %v728_v53 = vpop.f32.mrf.mxu1 }
 0x2f6   : > { %v734_v54 = vsel %vm1369_vm3, -1e+09, %v728_v53 }
 0x2f7   : > { %v735_v55 = vsel %vm334_vm1, %v734_v54, -inf  ;;  %v1075_v56 = vpop.f32.mrf.mxu1 }
 0x2f8   : > { %736 = vmax.xlane.f32.xlu1 %v735_v55 }
 0x2f9   : > { %v731_v57 = vpop.f32.mrf.mxu1 }
 0x2fb   : > { %v1076_v58 = vpop.f32.mrf.mxu1 }
 0x371   : > { %v506_v59 = vpop.xlane.xlu1 %505 }
 0x372   : > { %v507_v60 = vsub.f32 %v503_v42, %v506_v59 }
 0x374   : > { %v508_v61 = vmul.f32 1.442695, %v507_v60 }
 0x376   : > { %1156 = vpow2.f32 %v508_v61 }
 0x379   : > { %v623_v62 = vpop.xlane.xlu0 %622 }
 0x37a   : > { %v624_v63 = vsub.f32 %v620_v48, %v623_v62 }
 0x37c   : > { %v625_v1 = vmul.f32 1.442695, %v624_v63 }
 0x37e   : > { %1158 = vpow2.f32 %v625_v1 }
 0x381   : > { %v737_v7 = vpop.xlane.xlu1 %736 }
 0x382   : > { %v738_v8 = vsub.f32 %v734_v54, %v737_v7 }
 0x383   : > { %v1157_v2 = vpop.eup %1156 }
 0x384   : > { %v510_v3 = vsel %vm334_vm1, %v1157_v2, 0.0  ;;  %v739_v9 = vmul.f32 1.442695, %v738_v8 }
 0x385   : > { %511 = vadd.xlane.f32.xlu1 %v510_v3 }
 0x386   : > { %1160 = vpow2.f32 %v739_v9 }
 0x38b   : > { %v1159_v4 = vpop.eup %1158 }
 0x38c   : > { %v627_v5 = vsel %vm334_vm1, %v1159_v4, 0.0 }
 0x38d   : > { %628 = vadd.xlane.f32.xlu0 %v627_v5 }
 0x393   : > { %v1161_v10 = vpop.eup %1160 }
 0x394   : > { %v741_v11 = vsel %vm334_vm1, %v1161_v10, 0.0 }
 0x396   : > { %636 = vrot.lane.b32.xlu1 %v1005_v6, %s1250_s27  ;;  %s1456_s27 = scalar_lea.hbm %s1518_s5, %s1018_s16 }
 0x3a3   : > { %522 = vrot.lane.b32.xlu0 %v1005_v6, %s1249_s25 }
 0x3ba   : > { %742 = vadd.xlane.f32.xlu1 %v741_v11 }
 0x3cb   : > { %750 = vrot.lane.b32.xlu1 %v1005_v6, %s1251_s29  ;;  %s1462_s29 = scalar_lea.sflag [#allocation3], %s294_s11 }
 0x40e   : > { %v512_v12 = vpop.xlane.xlu1 %511 }
 0x40f   : > { %1162 = vrcp.f32 %v512_v12 }
 0x412   : > { %v637_v18 = vpop.permute.xlu1 %636 }
 0x413   : > { %v642_v20 = vsel %vm403_vm4, %v637_v18, 0 }
 0x416   : > { %v629_v13 = vpop.xlane.xlu0 %628 }
 0x417   : > { %1164 = vrcp.f32 %v629_v13 }
 0x41a   : > { %v523_v14 = vpop.permute.xlu0 %522 }
 0x41b   : > { %v528_v15 = vsel %vm403_vm4, %v523_v14, 0 }
 0x41c   : > { %v1163_v16 = vpop.eup %1162  ;;  %1054 = vmatpush3.bf16.msra.mxu0 %v528_v15 }
 0x41d   : > { %1065 = vmatprep.subr.bf16.mxu0 %v1246_v0  ;;  %v515_v17 = vmul.f32 %v1163_v16, %v1157_v2 }
 0x41f   : > { %v516_v19 = vpack.c.bf16 %v515_v17, %v515_v17 }
 0x421   : > { %1004 = vst.msk [vmem:[%s1396_s13 + $0x4] sm:$0xf] %vm398_vm5, %v516_v19  ;;  %1056 = vmatmul.mubr.msk.bf16.vlgmr.msra.gmra.mxu0 %vm334_vm1, %v516_v19 }
 0x422   : > { %1066 = vmatpush3.bf16.msra.mxu0 %v642_v20  ;;  %1067 = vmatprep.mubr.msk.bf16.mxu0 %vm1247_vm0, %v1246_v0 }
 0x423   : > { %1077 = vmatprep.subr.bf16.mxu0 %v1246_v0 }
 0x424   : > { %v1165_v21 = vpop.eup %1164 }
 0x425   : > { %v632_v22 = vmul.f32 %v1165_v21, %v1159_v4 }
 0x427   : > { %v633_v23 = vpack.c.bf16 %v632_v22, %v632_v22 }
 0x429   : > { %1008 = vst.msk [vmem:[%s1396_s13 + $0x8] sm:$0xf] %vm398_vm5, %v633_v23  ;;  %1068 = vmatmul.mubr.msk.bf16.vlgmr.msra.gmra.mxu0 %vm334_vm1, %v633_v23 }
 0x42a   : > { %1079 = vmatprep.mubr.msk.bf16.mxu0 %vm1247_vm0, %v1246_v0 }
 0x443   : > { %v743_v24 = vpop.xlane.xlu1 %742 }
 0x444   : > { %1166 = vrcp.f32 %v743_v24 }
 0x447   : > { %v751_v25 = vpop.permute.xlu1 %750 }
 0x448   : > { %v756_v26 = vsel %vm403_vm4, %v751_v25, 0 }
 0x449   : > { %1078 = vmatpush3.bf16.msra.mxu0 %v756_v26 }
 0x451   : > { %v1167_v27 = vpop.eup %1166 }
 0x452   : > { %v746_v28 = vmul.f32 %v1167_v27, %v1161_v10 }
 0x454   : > { %v747_v29 = vpack.c.bf16 %v746_v28, %v746_v28 }
 0x456   : > { %1011 = vst.msk [vmem:[%s1396_s13 + $0xc] sm:$0xf] %vm398_vm5, %v747_v29  ;;  %1080 = vmatmul.mubr.msk.bf16.vlgmr.msra.gmra.mxu0 %vm334_vm1, %v747_v29 }
 0x4e1   : > { %v564_v30 = vpop.f32.mrf.mxu0 }
 0x4e2   : > { %799 = vrot.lane.b32.xlu0 %v564_v30, %s1252_s14 }
 0x4e3   : > { %v1057_v0 = vpop.f32.mrf.mxu0 }
 0x4e5   : > { %v567_v31 = vpop.f32.mrf.mxu0 }
 0x4e7   : > { %v1058_v32 = vpop.f32.mrf.mxu0 }
 0x4e9   : > { %v678_v33 = vpop.f32.mrf.mxu0 }
 0x4ea   : > { %803 = vrot.lane.b32.xlu1 %v678_v33, %s1253_s15 }
 0x4eb   : > { %v1069_v34 = vpop.f32.mrf.mxu0 }
 0x4ed   : > { %v681_v35 = vpop.f32.mrf.mxu0 }
 0x4ef   : > { %v1070_v36 = vpop.f32.mrf.mxu0 }
 0x4f0   : > { %1181 = shalt.err (!%p1178_p5)
}
 0x4f1   : > { %s1182_s11 = scalar_lea.hbm %s1456_s27, 256  ;;  %s1186_s14 = scalar_lea.hbm %s1518_s5, 512 }
 0x4f2   : > { %p1183_p6 = scmp.ne.s32.totalorder %s1456_s27, %s1182_s11  ;;  %p1187_p10 = scmp.lt.s32.totalorder %s1456_s27, %s1518_s5 }
 0x4f3   : > { %p1188_p11 = scmp.lt.s32.totalorder %s1186_s14, %s1182_s11 }
 0x4f4   : > { %p1184_p7 = pnand %p1183_p6, %p1328_p4 }
 0x4f5   : > { %p1189_p12 = por %p1188_p11, %p1187_p10 }
 0x4f6   : > { %p1185_p9 = pneg %p1184_p7 }
 0x4f8   : > { %p1190_p13 = pnand %p1189_p12, %p1185_p9 }
 0x4fa   : > { %1193 = shalt.err (!%p1190_p13)
}
 0x4fb   : > { %s1255_s24 = smov 64   ;;  %s1256_s25 = smov 4   ;;  %vm811_vm6 = vcmask 130048   ;;  %vm813_vm7 = vcmask 195584   ;;  %vm816_vm8 = vcmask 257024  }
 0x4fc   : > { %1083 = dma.vmem_to_hbm [thread:$0]  (%p1328_p4), %s1458_s17, 256, %s1456_s27, %s1462_s29, %s1255_s24, %s1255_s24, %s1256_s25  }
 0x4fd   : > { %s1257_s7 = smov 24   ;;  %s325_s28 = scalar_lea.vmem %s1517_s4, %s1351_s8 }
 0x516   : > { %v792_v38 = vpop.f32.mrf.mxu0 }
 0x517   : > { %807 = vrot.lane.b32.xlu0 %v792_v38, %s1257_s7 }
 0x518   : > { %v1081_v39 = vpop.f32.mrf.mxu0 }
 0x51a   : > { %v795_v40 = vpop.f32.mrf.mxu0 }
 0x51c   : > { %v1082_v41 = vpop.f32.mrf.mxu0 }
 0x554   : > { %v800_v42 = vpop.permute.xlu0 %799 }
 0x555   : > { %v810_v44 = vsel %vm334_vm1, %v1414_v37, %v800_v42 }
 0x55c   : > { %v804_v43 = vpop.permute.xlu1 %803 }
 0x55d   : > { %v812_v45 = vsel %vm811_vm6, %v810_v44, %v804_v43 }
 0x589   : > { %v808_v46 = vpop.permute.xlu0 %807 }
 0x58a   : > { %v814_v47 = vsel %vm813_vm7, %v812_v45, %v808_v46 }
 0x58b   : > { %v815_v48 = vpack.c.bf16 %v814_v47, %v814_v47 }
 0x58d   : > { %817 = vst.msk [vmem:[%s325_s28] sm:$0xf] %vm816_vm8, %v815_v48 }
 0x58e PF: > { %p1089_p4 = scmp.ge.s32.totalorder %s1244_s23, 2  ;;  %s868_s17 = sand.u32 1, %s1224_s18  }
 0x58f   : > { %s869_s27 = scalar_lea.sflag [#allocation3], %s868_s17 }
 0x590   : > { %p1086_p0 = pnand %p1089_p4, %p1335_p8 }
 0x592   : > { %p1087_p1 = pneg %p1086_p0 }
 0x594   : > { %1219 = dma.done.wait (%p1087_p1), %s869_s27, 256  }
 0x595   : > { %1221 = vsyncadd (%p1087_p1), %s869_s27, 4294967040  ;;  %s19_s23 = sadd.s32 1, %s1244_s23   ;;  %s1523_s18 = smov %s1228_s19 }
 0x596   : > { %p16_p2 = scmp.ge.s32.totalorder %s19_s23, 4   ;;  %s1524_s19 = smov %s1232_s20 }
 0x597   : > { %s1525_s20 = smov %s1341_s6  ;;  %s1526_s21 = smov %s1240_s22 }
 0x598   : > { %s1527_s22 = smov %s1529_s26  ;;  %18 = sbr.rel (!%p16_p2) target bundleno = 4 (0x4), region = 95 }
 0x59d   :  { %874 = vsyncpa [#allocation3], 1 }
 0x59e   :  { %876 = vsyncpa [#allocation3 + $0x1], 1 }

</bundles_post_ra>
